<compile_context>
chip_gen: v6e
topology: v6e:2x2x1
jax: 0.10.0
libtpu: 0.0.40
codegen_flags: <defaults>
</compile_context>

<pallas_src>
import random
import numpy as np
import jax
import jax.numpy as jnp
from jax.experimental import pallas as pl
from jax.experimental.pallas import tpu as pltpu

C_IN = 48
C_OUT = 192
J_DIM = 18
SP = 28                 # both spatial extents (m, n)
COLS = SP * SP          # 784 flattened output columns (lane axis)
K_FUSED = 2 * C_IN      # 96 = contraction dim of the fused matmul
TILE_I = 96             # output-channel tile; grid = 192 / 96 = 2


def _fused_matmul_kernel(w_ref, x_ref, y_ref):
    # One MXU matmul per grid step: [TILE_I, 96](bf16) @ [96, 784](bf16) -> f32.
    # Xc has a constant index_map so it is DMA'd once and stays VMEM-resident;
    # each f32 output tile (~300 KB) pipelines against the other tile's compute.
    y_ref[...] = jnp.dot(w_ref[...], x_ref[...],
                         preferred_element_type=jnp.float32)


def kernel_generated_3_forward(x, w1, w2, shift_direction):
    """x: [1,48,28,28] (NCHW), w1: [192,2,18], w2: [2,48,18] -> [1,192,28,28]."""
    assert x.shape == (1, C_IN, SP, SP)
    assert w1.shape == (C_OUT, 2, J_DIM)
    assert w2.shape == (2, C_IN, J_DIM)
    assert shift_direction in (1, -1)

    # ---- weight fold (once per call in XLA, ~0.7 MFLOP) ---------------------
    WA = jnp.einsum('cj,ij->ci', w2[1], w1[:, 0, :])                  # [48, 192]
    WB = jnp.einsum('cj,ij->ci', w2[0], w1[:, 1, :])                  # [48, 192]
    WT = jnp.concatenate([WA, WB], axis=0).T.astype(jnp.bfloat16)     # [192, 96]

    # ---- input relayout (layout plumbing only, ~150 KB) ---------------------
    # XT[c, a, b] = x[0, c, b, a]; the roll of the flattened (n,k) axis reduces
    # to a roll of XT's middle axis by +/-1 on exactly one of the two copies.
    XT = jnp.transpose(x[0], (0, 2, 1))                               # [48, 28, 28]
    if shift_direction == 1:
        XA, XB = jnp.roll(XT, 1, axis=1), XT
    else:
        XA, XB = XT, jnp.roll(XT, -1, axis=1)
    Xc = jnp.concatenate([XA, XB], axis=0).reshape(K_FUSED, COLS)
    Xc = Xc.astype(jnp.bfloat16)                                      # [96, 784]

    # ---- single fused matmul kernel, tiled over output channels -------------
    y2d = pl.pallas_call(
        _fused_matmul_kernel,
        out_shape=jax.ShapeDtypeStruct((C_OUT, COLS), jnp.float32),
        grid=(C_OUT // TILE_I,),
        in_specs=[
            pl.BlockSpec((TILE_I, K_FUSED), lambda i: (i, 0)),   # weight tile
            pl.BlockSpec((K_FUSED, COLS), lambda i: (0, 0)),     # Xc, resident
        ],
        out_specs=pl.BlockSpec((TILE_I, COLS), lambda i: (i, 0)),
        compiler_params=pltpu.CompilerParams(
            dimension_semantics=("parallel",),
        ),
    )(WT, Xc)                                                         # [192, 784]

    # Row-major split of the last axis: free reshape, no transpose, no copy.
    return y2d.reshape(1, C_OUT, SP, SP)


def _reference_numpy(x, w1, w2, shift_direction):
    """Float64 numpy re-implementation of the exact torch op sequence."""
    x = np.asarray(x, np.float64)
    w1 = np.asarray(w1, np.float64)
    w2 = np.asarray(w2, np.float64)
    t3 = np.einsum('limn,kij->lnkmj', x, w2)
    t4 = t3.reshape(1, 56, 28, 18)
    t4 = np.roll(t4, shift_direction, axis=1)
    t4 = t4.reshape(1, 28, 2, 28, 18)
    return np.einsum('lmjnk,ijk->limn', t4, w1)


if __name__ == "__main__":
    # Deterministic stand-in for the module's random shift direction.
    random.seed(0)
    default_shift = int((random.random() > 0.5) * 2 - 1)

    # Deterministic inputs at the shapes the module's reshape constants imply.
    key = jax.random.PRNGKey(0)
    kx, k1, k2 = jax.random.split(key, 3)
    x = jax.random.normal(kx, (1, C_IN, SP, SP), dtype=jnp.float32)
    w1 = jax.random.normal(k1, (C_OUT, 2, J_DIM), dtype=jnp.float32)
    w2 = jax.random.normal(k2, (2, C_IN, J_DIM), dtype=jnp.float32)

    fwd = jax.jit(kernel_generated_3_forward, static_argnums=(3,))

    # Validate both possible shift directions (the module picks one at random).
    for shift in (default_shift, -default_shift):
        y = jax.block_until_ready(fwd(x, w1, w2, shift))
        assert y.shape == (1, C_OUT, SP, SP), y.shape
        ref = _reference_numpy(x, w1, w2, shift)
        err = np.max(np.abs(np.asarray(y, np.float64) - ref)) / (np.max(np.abs(ref)) + 1e-9)
        assert err < 2e-2, f"shift={shift}: max relative error too large: {err}"

    print("KERNEL_OK")
</pallas_src>

<mosaic_0001>
module attributes {stable_mosaic.version = 11 : i64} {
  func.func @_fused_matmul_kernel(%arg0: i32, %arg1: memref<96x96xbf16, #tpu.memory_space<vmem>>, %arg2: memref<96x784xbf16, #tpu.memory_space<vmem>>, %arg3: memref<96x784xf32, #tpu.memory_space<vmem>>) attributes {dimension_semantics = [#tpu.dimension_semantics<parallel>], iteration_bounds = array<i64: 2>, scalar_prefetch = 0 : i64, scratch_operands = 0 : i64, tpu.core_type = #tpu.core_type<tc>, window_params = [{transform_indices = @transform_0, window_bounds = array<i64: 96, 96>}, {pipeline_mode = #tpu.pipeline_mode<synchronous>, transform_indices = @transform_1, window_bounds = array<i64: 96, 784>}, {transform_indices = @transform_2, window_bounds = array<i64: 96, 784>}]} {
    %c0 = arith.constant 0 : index
    %c0_0 = arith.constant 0 : index
    %0 = vector.load %arg1[%c0, %c0_0] : memref<96x96xbf16, #tpu.memory_space<vmem>>, vector<96x96xbf16>
    %c0_1 = arith.constant 0 : index
    %c0_2 = arith.constant 0 : index
    %1 = vector.load %arg2[%c0_1, %c0_2] : memref<96x784xbf16, #tpu.memory_space<vmem>>, vector<96x784xbf16>
    %cst = arith.constant dense<0.000000e+00> : vector<96x784xf32>
    %2 = tpu.matmul %0, %1, %cst {dimension_numbers = #tpu.dot_dimension_numbers<[1], [0], [0], [1], [0, 0, 1, 1], [], []>} : vector<96x96xbf16>, vector<96x784xbf16>, vector<96x784xf32> -> vector<96x784xf32>
    %c0_3 = arith.constant 0 : index
    %c0_4 = arith.constant 0 : index
    %3 = vector.load %arg3[%c0_3, %c0_4] : memref<96x784xf32, #tpu.memory_space<vmem>>, vector<96x784xf32>
    tpu.vector_store %arg3[%c0_3, %c0_4], %2 {strides = array<i32>} : memref<96x784xf32, #tpu.memory_space<vmem>>, vector<96x784xf32>,
    return
  }
  func.func @transform_0(%arg0: i32) -> (i32, i32) {
    %c0_i32 = arith.constant 0 : i32
    %c0_i32_0 = arith.constant 0 : i32
    return %arg0, %c0_i32 : i32, i32
  }
  func.func @transform_1(%arg0: i32) -> (i32, i32) {
    %c0_i32 = arith.constant 0 : i32
    %c0_i32_0 = arith.constant 0 : i32
    %c0_i32_1 = arith.constant 0 : i32
    return %c0_i32, %c0_i32_0 : i32, i32
  }
  func.func @transform_2(%arg0: i32) -> (i32, i32) {
    %c0_i32 = arith.constant 0 : i32
    %c0_i32_0 = arith.constant 0 : i32
    return %arg0, %c0_i32 : i32, i32
  }
}

</mosaic_0001>

<bundles_post_ra>
// kernel: kernel_generated_3_forward.1
= control target key start
LH: loop header
LB: loop body
LE: loop exit
PB: predicated region body
PF: predicated region fallthrough
CT: control target
= control target key end

     0   :  { %s1195_s9 = smov 0   ;;  %s1502_s0 = inlined_call_operand.vmem [shape: bf16[192,96], index: 0, kind: input, shape index: {}]   ;;  %s1503_s1 = inlined_call_operand.vmem [shape: bf16[96,784], index: 1, kind: input, shape index: {}]   ;;  %s1504_s2 = inlined_call_operand.vmem [shape: f32[192,784], index: 2, kind: output, shape index: {}]  }
   0x1 LB: > { %s978_s10 = sadd.s32 4294967295, %s1177_s9   ;;  %p982_p0 = scmp.ge.s32.totalorder %s1177_s9, 1  ;;  %s1177_s9 = sphi %s1195_s9, %s12_s9  }
   0x2   : > { %p113_p1 = scmp.lt.s32.totalorder %s1177_s9, 3 }
   0x4   : > { %p114_p2 = pnand %p982_p0, %p113_p1 }
   0x5   : > { %s136_s13 = smul.u32 (!%p114_p2), 12, %s978_s10 }
   0x6   : > { %117 = sbr.rel (%p114_p2) target bundleno = 325 (0x145), region = 28 }
   0x7   : > { %p137_p3 = scmp.lt.s32.totalorder (!%p114_p2), %s136_s13, 23 }
   0xb   : > { %v1105_v0 = vld [vmem:[%s1503_s1 + $0x11c] ss:$28 sps:$4 sm:$0xff]   ;;  %v1179_v2 = vmov 0   ;;  %v1108_v3 = vld [vmem:[%s1503_s1 + $0xe4] ss:$28 sps:$4 sm:$0xff]   ;;  %s1506_s13 = smov (!%p137_p3, %s136_s13), 23 }
   0xc   : > { %v1107_v1 = vld [vmem:[%s1503_s1 + $0x118] ss:$28 sps:$4 sm:$0xff]   ;;  %507 = vmatprep.mubr.bf16.mxu0 %v1179_v2  ;;  %600 = vmatprep.mubr.bf16.mxu1 %v1179_v2  ;;  %v1110_v4 = vld [vmem:[%s1503_s1 + $0xe0] ss:$28 sps:$4 sm:$0xff]   ;;  %v1111_v5 = vld [vmem:[%s1503_s1 + $0xac] ss:$28 sps:$4 sm:$0xff]  }
   0xd   : > { %479 = vmatprep.subr.bf16.mxu0 %v1105_v0  ;;  %v1113_v6 = vld [vmem:[%s1503_s1 + $0xa8] ss:$28 sps:$4 sm:$0xff]   ;;  %s983_s24 = sshll.u32 %s1506_s13, 2  ;;  %v1114_v8 = vld [vmem:[%s1503_s1 + $0x74] ss:$28 sps:$4 sm:$0xff]   ;;  %vm456_vm0 = vcmask 785408  }
   0xe   : > { %480 = vmatpush1.bf16.msra.mxu0 %v1107_v1  ;;  %v1120_v7 = vld [vmem:[%s1503_s1 + $0x124] ss:$28 sps:$4 sm:$0xff]   ;;  %s1238_s5 = scalar_lea.vmem %s1502_s0, %s983_s24  ;;  %v1126_v10 = vld [vmem:[%s1503_s1 + $0xec] ss:$28 sps:$4 sm:$0xff]   ;;  %v1117_v13 = vld [vmem:[%s1503_s1 + $0x3c] ss:$28 sps:$4 sm:$0xff]  }
   0xf   : > { %481 = vmatprep.subr.bf16.mxu0 %v1108_v3  ;;  %v1124_v9 = vld [vmem:[%s1503_s1 + $0x120] ss:$28 sps:$4 sm:$0xff]   ;;  %572 = vmatprep.subr.bf16.mxu1 %v1120_v7  ;;  %v1116_v11 = vld [vmem:[%s1503_s1 + $0x70] ss:$28 sps:$4 sm:$0xff]   ;;  %v1129_v12 = vld [vmem:[%s1503_s1 + $0xe8] ss:$28 sps:$4 sm:$0xff]  }
  0x10   : > { %573 = vmatpush1.bf16.msra.mxu1 %v1124_v9  ;;  %v1119_v14 = vld [vmem:[%s1503_s1 + $0x38] ss:$28 sps:$4 sm:$0xff]   ;;  %v1135_v16 = vld [vmem:[%s1503_s1 + $0xb0] ss:$28 sps:$4 sm:$0xff]   ;;  %v1122_v18 = vld [vmem:[%s1503_s1 + $0x4] ss:$28 sps:$4 sm:$0xff]  }
  0x11   : > { %574 = vmatprep.subr.bf16.mxu1 %v1126_v10  ;;  %v1133_v15 = vld [vmem:[%s1503_s1 + $0xb4] ss:$28 sps:$4 sm:$0xff]   ;;  %v1136_v17 = vld [vmem:[%s1503_s1 + $0x7c] ss:$28 sps:$4 sm:$0xff]   ;;  %v1143_v21 = vld [vmem:[%s1503_s1 + $0x44] ss:$28 sps:$4 sm:$0xff]  }
  0x12   : > { %482 = vmatpush1.bf16.msra.mxu0 %v1110_v4  ;;  %v1125_v19 = vld [vmem:[%s1503_s1] ss:$28 sps:$4 sm:$0xff]   ;;  %v1139_v20 = vld [vmem:[%s1503_s1 + $0x78] ss:$28 sps:$4 sm:$0xff]   ;;  %v1132_v22 = vld [vmem:[%s1503_s1 + $0x12c] ss:$28 sps:$4 sm:$0xff]  }
  0x13   : > { %483 = vmatprep.subr.bf16.mxu0 %v1111_v5  ;;  %v1280_v23 = vld [vmem:[%s1238_s5] sm:$0xff]   ;;  %v1142_v26 = vld [vmem:[%s1503_s1 + $0xf4] ss:$28 sps:$4 sm:$0xff]   ;;  %v1146_v27 = vld [vmem:[%s1503_s1 + $0xc] ss:$28 sps:$4 sm:$0xff]   ;;  %vm841_vm1 = vcmask 130048  }
  0x14   : > { %575 = vmatpush1.bf16.msra.mxu1 %v1129_v12  ;;  %v1130_v24 = vld [vmem:[%s1503_s1 + $0x128] ss:$28 sps:$4 sm:$0xff]   ;;  %v1145_v25 = vld [vmem:[%s1503_s1 + $0x40] ss:$28 sps:$4 sm:$0xff]   ;;  %v1140_v28 = vld [vmem:[%s1503_s1 + $0xf0] ss:$28 sps:$4 sm:$0xff]  }
  0x15   : > { %576 = vmatprep.subr.bf16.mxu1 %v1133_v15  ;;  %v1149_v29 = vld [vmem:[%s1503_s1 + $0x8] ss:$28 sps:$4 sm:$0xff]   ;;  %v1157_v30 = vld [vmem:[%s1503_s1 + $0x130] ss:$28 sps:$4 sm:$0xff]   ;;  %v1152_v31 = vld [vmem:[%s1503_s1 + $0xbc] ss:$28 sps:$4 sm:$0xff]  }
  0x16   : > { %484 = vmatpush1.bf16.msra.mxu0 %v1113_v6  ;;  %v1310_v32 = vld [vmem:[%s1238_s5 + $0x8] sm:$0xff]   ;;  %v1150_v33 = vld [vmem:[%s1503_s1 + $0xb8] ss:$28 sps:$4 sm:$0xff]   ;;  %v1156_v34 = vld [vmem:[%s1503_s1 + $0x84] ss:$28 sps:$4 sm:$0xff]  }
  0x17   : > { %485 = vmatprep.subr.bf16.mxu0 %v1114_v8  ;;  %v1162_v35 = vld [vmem:[%s1503_s1 + $0xf8] ss:$28 sps:$4 sm:$0xff]   ;;  %v1154_v36 = vld [vmem:[%s1503_s1 + $0x80] ss:$28 sps:$4 sm:$0xff]   ;;  %v1161_v38 = vld [vmem:[%s1503_s1 + $0x4c] ss:$28 sps:$4 sm:$0xff]  }
  0x18   : > { %577 = vmatpush1.bf16.msra.mxu1 %v1135_v16  ;;  %v1167_v37 = vld [vmem:[%s1503_s1 + $0xc0] ss:$28 sps:$4 sm:$0xff]   ;;  %v1148_v39 = vld [vmem:[%s1238_s5 + $0x10] sm:$0xff]   ;;  %v1159_v40 = vld [vmem:[%s1503_s1 + $0x48] ss:$28 sps:$4 sm:$0xff]  }
  0x19   : > { %578 = vmatprep.subr.bf16.mxu1 %v1136_v17  ;;  %v1166_v41 = vld [vmem:[%s1503_s1 + $0x14] ss:$28 sps:$4 sm:$0xff]   ;;  %v1168_v42 = vld [vmem:[%s1503_s1 + $0x88] ss:$28 sps:$4 sm:$0xff]   ;;  %v1153_v45 = vld [vmem:[%s1238_s5 + $0x18] sm:$0xff]  }
  0x1a   : > { %486 = vmatpush1.bf16.msra.mxu0 %v1116_v11  ;;  %v1164_v43 = vld [vmem:[%s1503_s1 + $0x10] ss:$28 sps:$4 sm:$0xff]   ;;  %v1170_v46 = vld [vmem:[%s1503_s1 + $0x18] ss:$28 sps:$4 sm:$0xff]   ;;  %v1158_v47 = vld [vmem:[%s1238_s5 + $0x20] sm:$0xff]  }
  0x1b   : > { %487 = vmatprep.subr.bf16.mxu0 %v1117_v13  ;;  %v1169_v44 = vld [vmem:[%s1503_s1 + $0x50] ss:$28 sps:$4 sm:$0xff]  }
  0x1c   : > { %579 = vmatpush1.bf16.msra.mxu1 %v1139_v20  ;;  %v1163_v48 = vld [vmem:[%s1238_s5 + $0x28] sm:$0xff]   ;;  %s1095_s5 = smul.u32 56, %s1506_s13 }
  0x1d   : > { %580 = vmatprep.subr.bf16.mxu1 %v1143_v21 }
  0x1e   : > { %488 = vmatpush1.bf16.msra.mxu0 %v1119_v14  ;;  %s1401_s26 = scalar_lea.vmem %s1504_s2, %s1095_s5 }
  0x1f   : > { %489 = vmatprep.subr.bf16.mxu0 %v1122_v18 }
  0x20   : > { %581 = vmatpush1.bf16.msra.mxu1 %v1145_v25 }
  0x21   : > { %582 = vmatprep.subr.bf16.mxu1 %v1146_v27 }
  0x22   : > { %490 = vmatpush1.bf16.msra.mxu0 %v1125_v19 }
  0x23   : > { %665 = vmatprep.subr.bf16.mxu0 %v1132_v22 }
  0x24   : > { %583 = vmatpush1.bf16.msra.mxu1 %v1149_v29 }
  0x25   : > { %1033 = vmatmul.mubr.msk.bf16.vlgmr.msra.gmra.mxu0 %vm456_vm0, %v1280_v23  ;;  %1071 = vmatprep.subr.bf16.mxu1 %v1157_v30 }
  0x26   : > { %666 = vmatpush1.bf16.msra.mxu0 %v1130_v24  ;;  %517 = vmatprep.mubr.bf16.mxu0 %v1179_v2 }
  0x27   : > { %667 = vmatprep.subr.bf16.mxu0 %v1142_v26  ;;  %1039 = vmatmul.mubr.msk.bf16.vlgmr.msra.gmra.mxu1 %vm456_vm0, %v1280_v23 }
  0x28   : > { %1072 = vmatpush3.bf16.msra.mxu1 %v1157_v30  ;;  %610 = vmatprep.mubr.bf16.mxu1 %v1179_v2 }
  0x29   : > { %1073 = vmatprep.subr.bf16.mxu1 %v1162_v35 }
  0x2a   : > { %668 = vmatpush1.bf16.msra.mxu0 %v1140_v28 }
  0x2b   : > { %669 = vmatprep.subr.bf16.mxu0 %v1152_v31 }
  0x2c   : > { %1074 = vmatpush3.bf16.msra.mxu1 %v1162_v35 }
  0x2d   : > { %1034 = vmatmul.mubr.msk.bf16.gmra.mxu0 %vm456_vm0, %v1310_v32  ;;  %1075 = vmatprep.subr.bf16.mxu1 %v1167_v37 }
  0x2e   : > { %527 = vmatprep.mubr.bf16.mxu0 %v1179_v2  ;;  %670 = vmatpush1.bf16.msra.mxu0 %v1150_v33 }
  0x2f   : > { %671 = vmatprep.subr.bf16.mxu0 %v1156_v34  ;;  %1040 = vmatmul.mubr.msk.bf16.gmra.mxu1 %vm456_vm0, %v1310_v32 }
  0x30   : > { %620 = vmatprep.mubr.bf16.mxu1 %v1179_v2  ;;  %1076 = vmatpush3.bf16.msra.mxu1 %v1167_v37 }
  0x31   : > { %1077 = vmatprep.subr.bf16.mxu1 %v1168_v42 }
  0x32   : > { %672 = vmatpush1.bf16.msra.mxu0 %v1154_v36 }
  0x33   : > { %673 = vmatprep.subr.bf16.mxu0 %v1161_v38 }
  0x34   : > { %1078 = vmatpush3.bf16.msra.mxu1 %v1168_v42 }
  0x35   : > { %1035 = vmatmul.mubr.msk.bf16.gmra.mxu0 %vm456_vm0, %v1148_v39  ;;  %1079 = vmatprep.subr.bf16.mxu1 %v1169_v44 }
  0x36   : > { %537 = vmatprep.mubr.bf16.mxu0 %v1179_v2  ;;  %674 = vmatpush1.bf16.msra.mxu0 %v1159_v40 }
  0x37   : > { %675 = vmatprep.subr.bf16.mxu0 %v1166_v41  ;;  %1041 = vmatmul.mubr.msk.bf16.gmra.mxu1 %vm456_vm0, %v1148_v39 }
  0x38   : > { %630 = vmatprep.mubr.bf16.mxu1 %v1179_v2  ;;  %1080 = vmatpush3.bf16.msra.mxu1 %v1169_v44 }
  0x39   : > { %1081 = vmatprep.subr.bf16.mxu1 %v1170_v46 }
  0x3a   : > { %676 = vmatpush1.bf16.msra.mxu0 %v1164_v43 }
  0x3c   : > { %1082 = vmatpush3.bf16.msra.mxu1 %v1170_v46 }
  0x3d   : > { %1036 = vmatmul.mubr.msk.bf16.gmra.mxu0 %vm456_vm0, %v1153_v45 }
  0x3e   : > { %547 = vmatprep.mubr.bf16.mxu0 %v1179_v2 }
  0x3f   : > { %1042 = vmatmul.mubr.msk.bf16.gmra.mxu1 %vm456_vm0, %v1153_v45 }
  0x40   : > { %640 = vmatprep.mubr.bf16.mxu1 %v1179_v2 }
  0x45   : > { %1037 = vmatmul.mubr.msk.bf16.gmra.mxu0 %vm456_vm0, %v1158_v47 }
  0x46   : > { %557 = vmatprep.mubr.bf16.mxu0 %v1179_v2 }
  0x47   : > { %1043 = vmatmul.mubr.msk.bf16.gmra.mxu1 %vm456_vm0, %v1158_v47 }
  0x48   : > { %650 = vmatprep.mubr.bf16.mxu1 %v1179_v2 }
  0x4d   : > { %1038 = vmatmul.mubr.msk.bf16.gmra.mxu0 %vm456_vm0, %v1163_v48 }
  0x4e   : > { %693 = vmatprep.mubr.bf16.mxu0 %v1179_v2 }
  0x4f   : > { %1044 = vmatmul.mubr.msk.bf16.gmra.mxu1 %vm456_vm0, %v1163_v48 }
  0x50   : > { %1083 = vmatprep.mubr.msk.bf16.mxu1 %vm456_vm0, %v1280_v23 }
  0x55   : > { %1045 = vmatmul.mubr.msk.bf16.vlgmr.msra.gmra.mxu0 %vm456_vm0, %v1280_v23 }
  0x56   : > { %703 = vmatprep.mubr.bf16.mxu0 %v1179_v2 }
  0x57   : > { %1084 = vmatmul.mubr.msk.bf16.vlgmr.msra.gmra.mxu1 %vm456_vm0, %v1310_v32 }
  0x58   : > { %1087 = vmatprep.mubr.msk.bf16.mxu1 %vm456_vm0, %v1148_v39 }
  0x5d   : > { %1046 = vmatmul.mubr.msk.bf16.gmra.mxu0 %vm456_vm0, %v1310_v32 }
  0x5e   : > { %713 = vmatprep.mubr.bf16.mxu0 %v1179_v2 }
  0x5f   : > { %1088 = vmatmul.mubr.msk.bf16.gmra.mxu1 %vm456_vm0, %v1153_v45 }
  0x60   : > { %1091 = vmatprep.mubr.msk.bf16.mxu1 %vm456_vm0, %v1158_v47 }
  0x65   : > { %1047 = vmatmul.mubr.msk.bf16.gmra.mxu0 %vm456_vm0, %v1148_v39 }
  0x66   : > { %723 = vmatprep.mubr.bf16.mxu0 %v1179_v2 }
  0x67   : > { %1092 = vmatmul.mubr.msk.bf16.gmra.mxu1 %vm456_vm0, %v1163_v48 }
  0x6d   : > { %1048 = vmatmul.mubr.msk.bf16.gmra.mxu0 %vm456_vm0, %v1153_v45 }
  0x6e   : > { %733 = vmatprep.mubr.bf16.mxu0 %v1179_v2 }
  0x75   : > { %1049 = vmatmul.mubr.msk.bf16.gmra.mxu0 %vm456_vm0, %v1158_v47 }
  0x76   : > { %743 = vmatprep.mubr.bf16.mxu0 %v1179_v2 }
  0x7d   : > { %1050 = vmatmul.mubr.msk.bf16.gmra.mxu0 %vm456_vm0, %v1163_v48 }
  0xe5   : > { %v509_v49 = vpop.f32.mrf.mxu0 }
  0xe6   : > { %835 = vst [vmem:[%s1401_s26] sm:$0xff] %v509_v49 }
  0xe7   : > { %v511_v50 = vpop.f32.mrf.mxu0  ;;  %v602_v53 = vpop.f32.mrf.mxu1 }
  0xe8   : > { %836 = vst [vmem:[%s1401_s26 + $0x8] sm:$0xff] %v511_v50  ;;  %837 = vst [vmem:[%s1401_s26 + $0x10] sm:$0xff] %v602_v53 }
  0xe9   : > { %v513_v51 = vpop.f32.mrf.mxu0  ;;  %v604_v55 = vpop.f32.mrf.mxu1 }
  0xea   : > { %843 = vst [vmem:[%s1401_s26 + $0x38] sm:$0xff] %v513_v51  ;;  %838 = vst [vmem:[%s1401_s26 + $0x18] sm:$0xff] %v604_v55 }
  0xeb   : > { %v515_v52 = vpop.f32.mrf.mxu0  ;;  %v606_v57 = vpop.f32.mrf.mxu1 }
  0xec   : > { %844 = vst [vmem:[%s1401_s26 + $0x40] sm:$0xff] %v515_v52  ;;  %845 = vst [vmem:[%s1401_s26 + $0x48] sm:$0xff] %v606_v57 }
  0xed   : > { %v519_v54 = vpop.f32.mrf.mxu0  ;;  %v608_v59 = vpop.f32.mrf.mxu1 }
  0xee   : > { %850 = vst [vmem:[%s1401_s26 + $0x70] sm:$0xff] %v519_v54  ;;  %846 = vst [vmem:[%s1401_s26 + $0x50] sm:$0xff] %v608_v59 }
  0xef   : > { %v521_v56 = vpop.f32.mrf.mxu0  ;;  %v612_v61 = vpop.f32.mrf.mxu1 }
  0xf0   : > { %851 = vst [vmem:[%s1401_s26 + $0x78] sm:$0xff] %v521_v56  ;;  %852 = vst [vmem:[%s1401_s26 + $0x80] sm:$0xff] %v612_v61 }
  0xf1   : > { %v523_v58 = vpop.f32.mrf.mxu0  ;;  %v614_v63 = vpop.f32.mrf.mxu1 }
  0xf2   : > { %857 = vst [vmem:[%s1401_s26 + $0xa8] sm:$0xff] %v523_v58  ;;  %853 = vst [vmem:[%s1401_s26 + $0x88] sm:$0xff] %v614_v63 }
  0xf3   : > { %v525_v60 = vpop.f32.mrf.mxu0  ;;  %v616_v1 = vpop.f32.mrf.mxu1 }
  0xf4   : > { %858 = vst [vmem:[%s1401_s26 + $0xb0] sm:$0xff] %v525_v60  ;;  %859 = vst [vmem:[%s1401_s26 + $0xb8] sm:$0xff] %v616_v1 }
  0xf5   : > { %v529_v62 = vpop.f32.mrf.mxu0  ;;  %v618_v3 = vpop.f32.mrf.mxu1 }
  0xf6   : > { %864 = vst [vmem:[%s1401_s26 + $0xe0] sm:$0xff] %v529_v62  ;;  %860 = vst [vmem:[%s1401_s26 + $0xc0] sm:$0xff] %v618_v3 }
  0xf7   : > { %v531_v0 = vpop.f32.mrf.mxu0  ;;  %v622_v5 = vpop.f32.mrf.mxu1 }
  0xf8   : > { %865 = vst [vmem:[%s1401_s26 + $0xe8] sm:$0xff] %v531_v0  ;;  %866 = vst [vmem:[%s1401_s26 + $0xf0] sm:$0xff] %v622_v5 }
  0xf9   : > { %v533_v2 = vpop.f32.mrf.mxu0  ;;  %v624_v7 = vpop.f32.mrf.mxu1 }
  0xfa   : > { %871 = vst [vmem:[%s1401_s26 + $0x118] sm:$0xff] %v533_v2  ;;  %867 = vst [vmem:[%s1401_s26 + $0xf8] sm:$0xff] %v624_v7 }
  0xfb   : > { %v535_v4 = vpop.f32.mrf.mxu0  ;;  %v626_v9 = vpop.f32.mrf.mxu1 }
  0xfc   : > { %872 = vst [vmem:[%s1401_s26 + $0x120] sm:$0xff] %v535_v4  ;;  %873 = vst [vmem:[%s1401_s26 + $0x128] sm:$0xff] %v626_v9 }
  0xfd   : > { %v539_v6 = vpop.f32.mrf.mxu0  ;;  %v628_v11 = vpop.f32.mrf.mxu1 }
  0xfe   : > { %878 = vst [vmem:[%s1401_s26 + $0x150] sm:$0xff] %v539_v6  ;;  %874 = vst [vmem:[%s1401_s26 + $0x130] sm:$0xff] %v628_v11 }
  0xff   : > { %v541_v8 = vpop.f32.mrf.mxu0  ;;  %v632_v13 = vpop.f32.mrf.mxu1 }
 0x100   : > { %879 = vst [vmem:[%s1401_s26 + $0x158] sm:$0xff] %v541_v8  ;;  %880 = vst [vmem:[%s1401_s26 + $0x160] sm:$0xff] %v632_v13 }
 0x101   : > { %v543_v10 = vpop.f32.mrf.mxu0  ;;  %v634_v15 = vpop.f32.mrf.mxu1 }
 0x102   : > { %885 = vst [vmem:[%s1401_s26 + $0x188] sm:$0xff] %v543_v10  ;;  %881 = vst [vmem:[%s1401_s26 + $0x168] sm:$0xff] %v634_v15 }
 0x103   : > { %v545_v12 = vpop.f32.mrf.mxu0  ;;  %v636_v17 = vpop.f32.mrf.mxu1 }
 0x104   : > { %886 = vst [vmem:[%s1401_s26 + $0x190] sm:$0xff] %v545_v12  ;;  %887 = vst [vmem:[%s1401_s26 + $0x198] sm:$0xff] %v636_v17 }
 0x105   : > { %v549_v14 = vpop.f32.mrf.mxu0  ;;  %v638_v19 = vpop.f32.mrf.mxu1 }
 0x106   : > { %892 = vst [vmem:[%s1401_s26 + $0x1c0] sm:$0xff] %v549_v14  ;;  %888 = vst [vmem:[%s1401_s26 + $0x1a0] sm:$0xff] %v638_v19 }
 0x107   : > { %v551_v16 = vpop.f32.mrf.mxu0  ;;  %v642_v21 = vpop.f32.mrf.mxu1 }
 0x108   : > { %893 = vst [vmem:[%s1401_s26 + $0x1c8] sm:$0xff] %v551_v16  ;;  %894 = vst [vmem:[%s1401_s26 + $0x1d0] sm:$0xff] %v642_v21 }
 0x109   : > { %v553_v18 = vpop.f32.mrf.mxu0  ;;  %v644_v23 = vpop.f32.mrf.mxu1 }
 0x10a   : > { %899 = vst [vmem:[%s1401_s26 + $0x1f8] sm:$0xff] %v553_v18  ;;  %895 = vst [vmem:[%s1401_s26 + $0x1d8] sm:$0xff] %v644_v23 }
 0x10b   : > { %v555_v20 = vpop.f32.mrf.mxu0  ;;  %v646_v25 = vpop.f32.mrf.mxu1 }
 0x10c   : > { %900 = vst [vmem:[%s1401_s26 + $0x200] sm:$0xff] %v555_v20  ;;  %901 = vst [vmem:[%s1401_s26 + $0x208] sm:$0xff] %v646_v25 }
 0x10d   : > { %v559_v22 = vpop.f32.mrf.mxu0  ;;  %v648_v27 = vpop.f32.mrf.mxu1 }
 0x10e   : > { %906 = vst [vmem:[%s1401_s26 + $0x230] sm:$0xff] %v559_v22  ;;  %902 = vst [vmem:[%s1401_s26 + $0x210] sm:$0xff] %v648_v27 }
 0x10f   : > { %v561_v24 = vpop.f32.mrf.mxu0  ;;  %v652_v29 = vpop.f32.mrf.mxu1 }
 0x110   : > { %907 = vst [vmem:[%s1401_s26 + $0x238] sm:$0xff] %v561_v24  ;;  %908 = vst [vmem:[%s1401_s26 + $0x240] sm:$0xff] %v652_v29 }
 0x111   : > { %v563_v26 = vpop.f32.mrf.mxu0  ;;  %v654_v31 = vpop.f32.mrf.mxu1 }
 0x112   : > { %913 = vst [vmem:[%s1401_s26 + $0x268] sm:$0xff] %v563_v26  ;;  %909 = vst [vmem:[%s1401_s26 + $0x248] sm:$0xff] %v654_v31 }
 0x113   : > { %v565_v28 = vpop.f32.mrf.mxu0  ;;  %v656_v33 = vpop.f32.mrf.mxu1 }
 0x114   : > { %914 = vst [vmem:[%s1401_s26 + $0x270] sm:$0xff] %v565_v28  ;;  %915 = vst [vmem:[%s1401_s26 + $0x278] sm:$0xff] %v656_v33 }
 0x115   : > { %v695_v30 = vpop.f32.mrf.mxu0  ;;  %v658_v35 = vpop.f32.mrf.mxu1 }
 0x116   : > { %839 = vst [vmem:[%s1401_s26 + $0x20] sm:$0xff] %v695_v30  ;;  %916 = vst [vmem:[%s1401_s26 + $0x280] sm:$0xff] %v658_v35 }
 0x117   : > { %v697_v32 = vpop.f32.mrf.mxu0  ;;  %v1085_v37 = vpop.f32.mrf.mxu1 }
 0x118   : > { %840 = vst [vmem:[%s1401_s26 + $0x28] sm:$0xff] %v697_v32  ;;  %856 = vst.msk [vmem:[%s1401_s26 + $0xa0] sm:$0xff] %vm841_vm1, %v1085_v37 }
 0x119   : > { %v699_v34 = vpop.f32.mrf.mxu0  ;;  %v788_v39 = vpop.f32.mrf.mxu1 }
 0x11a   : > { %847 = vst [vmem:[%s1401_s26 + $0x58] sm:$0xff] %v699_v34  ;;  %842 = vst.msk [vmem:[%s1401_s26 + $0x30] sm:$0xff] %vm841_vm1, %v788_v39 }
 0x11b   : > { %v701_v36 = vpop.f32.mrf.mxu0  ;;  %v1086_v41 = vpop.f32.mrf.mxu1 }
 0x11c   : > { %848 = vst [vmem:[%s1401_s26 + $0x60] sm:$0xff] %v701_v36  ;;  %863 = vst.msk [vmem:[%s1401_s26 + $0xd8] sm:$0xff] %vm841_vm1, %v1086_v41 }
 0x11d   : > { %v705_v38 = vpop.f32.mrf.mxu0  ;;  %v791_v43 = vpop.f32.mrf.mxu1 }
 0x11e   : > { %854 = vst [vmem:[%s1401_s26 + $0x90] sm:$0xff] %v705_v38  ;;  %849 = vst.msk [vmem:[%s1401_s26 + $0x68] sm:$0xff] %vm841_vm1, %v791_v43 }
 0x11f   : > { %v707_v40 = vpop.f32.mrf.mxu0  ;;  %v1089_v45 = vpop.f32.mrf.mxu1 }
 0x120   : > { %855 = vst [vmem:[%s1401_s26 + $0x98] sm:$0xff] %v707_v40  ;;  %884 = vst.msk [vmem:[%s1401_s26 + $0x180] sm:$0xff] %vm841_vm1, %v1089_v45 }
 0x121   : > { %v709_v42 = vpop.f32.mrf.mxu0  ;;  %v804_v47 = vpop.f32.mrf.mxu1 }
 0x122   : > { %861 = vst [vmem:[%s1401_s26 + $0xc8] sm:$0xff] %v709_v42  ;;  %870 = vst.msk [vmem:[%s1401_s26 + $0x110] sm:$0xff] %vm841_vm1, %v804_v47 }
 0x123   : > { %v711_v44 = vpop.f32.mrf.mxu0  ;;  %v1090_v49 = vpop.f32.mrf.mxu1 }
 0x124   : > { %862 = vst [vmem:[%s1401_s26 + $0xd0] sm:$0xff] %v711_v44  ;;  %891 = vst.msk [vmem:[%s1401_s26 + $0x1b8] sm:$0xff] %vm841_vm1, %v1090_v49 }
 0x125   : > { %v715_v46 = vpop.f32.mrf.mxu0  ;;  %v807_v51 = vpop.f32.mrf.mxu1 }
 0x126   : > { %868 = vst [vmem:[%s1401_s26 + $0x100] sm:$0xff] %v715_v46  ;;  %877 = vst.msk [vmem:[%s1401_s26 + $0x148] sm:$0xff] %vm841_vm1, %v807_v51 }
 0x127   : > { %v717_v48 = vpop.f32.mrf.mxu0  ;;  %v1093_v53 = vpop.f32.mrf.mxu1 }
 0x128   : > { %869 = vst [vmem:[%s1401_s26 + $0x108] sm:$0xff] %v717_v48  ;;  %912 = vst.msk [vmem:[%s1401_s26 + $0x260] sm:$0xff] %vm841_vm1, %v1093_v53 }
 0x129   : > { %v719_v50 = vpop.f32.mrf.mxu0  ;;  %v820_v55 = vpop.f32.mrf.mxu1 }
 0x12a   : > { %875 = vst [vmem:[%s1401_s26 + $0x138] sm:$0xff] %v719_v50  ;;  %898 = vst.msk [vmem:[%s1401_s26 + $0x1f0] sm:$0xff] %vm841_vm1, %v820_v55 }
 0x12b   : > { %v721_v52 = vpop.f32.mrf.mxu0  ;;  %v1094_v57 = vpop.f32.mrf.mxu1 }
 0x12c   : > { %876 = vst [vmem:[%s1401_s26 + $0x140] sm:$0xff] %v721_v52  ;;  %919 = vst.msk [vmem:[%s1401_s26 + $0x298] sm:$0xff] %vm841_vm1, %v1094_v57 }
 0x12d   : > { %v725_v54 = vpop.f32.mrf.mxu0  ;;  %v823_v59 = vpop.f32.mrf.mxu1 }
 0x12e   : > { %882 = vst [vmem:[%s1401_s26 + $0x170] sm:$0xff] %v725_v54  ;;  %905 = vst.msk [vmem:[%s1401_s26 + $0x228] sm:$0xff] %vm841_vm1, %v823_v59 }
 0x12f   : > { %v727_v56 = vpop.f32.mrf.mxu0 }
 0x130   : > { %883 = vst [vmem:[%s1401_s26 + $0x178] sm:$0xff] %v727_v56 }
 0x131   : > { %v729_v58 = vpop.f32.mrf.mxu0 }
 0x132   : > { %889 = vst [vmem:[%s1401_s26 + $0x1a8] sm:$0xff] %v729_v58 }
 0x133   : > { %v731_v60 = vpop.f32.mrf.mxu0 }
 0x134   : > { %890 = vst [vmem:[%s1401_s26 + $0x1b0] sm:$0xff] %v731_v60 }
 0x135   : > { %v735_v61 = vpop.f32.mrf.mxu0 }
 0x136   : > { %896 = vst [vmem:[%s1401_s26 + $0x1e0] sm:$0xff] %v735_v61 }
 0x137   : > { %v737_v62 = vpop.f32.mrf.mxu0 }
 0x138   : > { %897 = vst [vmem:[%s1401_s26 + $0x1e8] sm:$0xff] %v737_v62 }
 0x139   : > { %v739_v63 = vpop.f32.mrf.mxu0 }
 0x13a   : > { %903 = vst [vmem:[%s1401_s26 + $0x218] sm:$0xff] %v739_v63 }
 0x13b   : > { %v741_v0 = vpop.f32.mrf.mxu0 }
 0x13c   : > { %904 = vst [vmem:[%s1401_s26 + $0x220] sm:$0xff] %v741_v0 }
 0x13d   : > { %v745_v1 = vpop.f32.mrf.mxu0 }
 0x13e   : > { %910 = vst [vmem:[%s1401_s26 + $0x250] sm:$0xff] %v745_v1 }
 0x13f   : > { %v747_v2 = vpop.f32.mrf.mxu0 }
 0x140   : > { %911 = vst [vmem:[%s1401_s26 + $0x258] sm:$0xff] %v747_v2 }
 0x141   : > { %v749_v3 = vpop.f32.mrf.mxu0 }
 0x142   : > { %917 = vst [vmem:[%s1401_s26 + $0x288] sm:$0xff] %v749_v3 }
 0x143   : > { %v751_v4 = vpop.f32.mrf.mxu0 }
 0x144   : > { %918 = vst [vmem:[%s1401_s26 + $0x290] sm:$0xff] %v751_v4 }
 0x145 PF: > { %s12_s9 = sadd.s32 1, %s1177_s9  }
 0x146   : > { %p9_p4 = scmp.ge.s32.totalorder %s12_s9, 4  }
 0x148   :  { %11 = sbr.rel (!%p9_p4) target bundleno = 1 (0x1), region = 58 }

</bundles_post_ra>
